<compile_context>
chip_gen: v6e
topology: v6e:2x2x1
jax: 0.10.0
libtpu: 0.0.40
codegen_flags: <defaults>
</compile_context>

<pallas_src>
import jax
import jax.numpy as jnp
import numpy as np
from jax.experimental import pallas as pl
from jax.experimental.pallas import tpu as pltpu


def _pick_tile_rows(R, max_rows=1024):
    """Largest row-tile <= max_rows that divides R and keeps (8,128) alignment."""
    if R <= max_rows:
        return R
    for t in range(max_rows, 7, -1):
        if t % 8 == 0 and R % t == 0:
            return t
    return R  # fall back to full extent (always legal)


def _odoc_inter_vessel_kernel(w1_ref, m2_ref, s2_ref, w2b_ref,
                              od_ref, ve_ref, out_ref):
    # Dense (TILE_R, 128) f32 slabs; Cf == 1 so the single feature channel is
    # the whole slab.
    od = od_ref[0]
    ve = ve_ref[0]

    hid = m2_ref.shape[0]      # in_channels // reduction  (= 3)
    cout = w2b_ref.shape[0]    # out_channels              (= 3)

    m = od * ve                # shared across all h1 channels

    # se1 conv #1 on the implicit concat [od*ve, od+ve, od] + ReLU, with the
    # concat folded into per-channel scalars: h1 = relu(a*m + b*od + c*ve).
    h1 = []
    for j in range(hid):
        acc = w1_ref[j, 0] * m + w1_ref[j, 1] * od + w1_ref[j, 2] * ve
        h1.append(jnp.maximum(acc, 0.0))

    # Folded (se1 conv #2) -> (+odoc) -> (se2 conv #1) + ReLU:
    #   h2[k] = relu( (w2a @ w1b)[k,:] . h1  +  (sum_i w2a[k,i]) * od )
    h2 = []
    for k in range(hid):
        acc = m2_ref[k, 0] * h1[0]
        for j in range(1, hid):
            acc = acc + m2_ref[k, j] * h1[j]
        h2.append(jnp.maximum(acc + s2_ref[k] * od, 0.0))

    # se2 conv #2, then + odoc; one dense per-channel store each.
    for c in range(cout):
        acc = w2b_ref[c, 0] * h2[0]
        for j in range(1, hid):
            acc = acc + w2b_ref[c, j] * h2[j]
        out_ref[0, c] = (acc + od).astype(out_ref.dtype)
    # TODO(synk): self.sigmoid exists in __init__ but is unused in forward -> omitted.


def init_params(in_channels, out_channels, reduction, key):
    """Deterministic synthetic weights matching the nn.Module __init__ shapes.
    1x1 conv weights (out, in, 1, 1) are stored squeezed as (out, in)."""
    hid = in_channels // reduction
    k1, k2, k3, k4 = jax.random.split(key, 4)
    s = 0.1
    w1a = jax.random.normal(k1, (hid, in_channels), jnp.float32) * s   # se1[0]
    w1b = jax.random.normal(k2, (out_channels, hid), jnp.float32) * s  # se1[2]
    w2a = jax.random.normal(k3, (hid, in_channels), jnp.float32) * s   # se2[0]
    w2b = jax.random.normal(k4, (out_channels, hid), jnp.float32) * s  # se2[2]
    return w1a, w1b, w2a, w2b


def odoc_inter_vessel(odoc, vessel, params, *, max_tile_rows=1024):
    """odoc/vessel: NCHW float32 (Cf == 1); returns NCHW (N, out_channels, H, W)."""
    w1a, w1b, w2a, w2b = params
    N, Cf, H, W = odoc.shape
    P = H * W
    assert P % 128 == 0, "flattened spatial dim must be lane-aligned (H*W % 128 == 0)"
    assert Cf == 1, "only the shape-consistent Cf==1 configuration is supported"
    R = P // 128

    hid, Cin = w1a.shape
    Cout = w1b.shape[0]
    assert Cin == 3 * Cf, "se1 in_channels must equal 3 * feature channels"
    assert w2a.shape == (hid, Cin) and w2b.shape == (Cout, hid)
    assert Cout == Cin, "se2 consumes out_se1_add; requires out_channels == in_channels"

    # --- wrapper-side weight folding (tiny 3x3 algebra, done once in XLA) ---
    # h1 = relu(w1a[:,0]*(od*ve) + (w1a[:,1]+w1a[:,2])*od + w1a[:,1]*ve)
    w1_fold = jnp.stack([w1a[:, 0], w1a[:, 1] + w1a[:, 2], w1a[:, 1]], axis=1)  # (hid, 3)
    m2 = jnp.dot(w2a, w1b)                      # (hid, hid)  : se2conv1 o se1conv2
    s2 = jnp.sum(w2a, axis=1)                   # (hid,)      : se2conv1 acting on +odoc

    TILE_R = _pick_tile_rows(R, max_tile_rows)
    num_tiles = R // TILE_R

    # Dense spatial slabs: (N, R, 128).
    od = odoc.reshape(N, R, 128)
    ve = vessel.reshape(N, R, 128)

    # Advisory cost estimate (elementwise/VPU-only kernel, HBM-bound).
    flops = 64 * N * P
    bytes_accessed = 4 * N * P * (2 + Cout) + 4 * (w1_fold.size + m2.size
                                                   + s2.size + w2b.size)

    out = pl.pallas_call(
        _odoc_inter_vessel_kernel,
        out_shape=jax.ShapeDtypeStruct((N, Cout, R, 128), odoc.dtype),
        grid=(N, num_tiles),
        in_specs=[
            # Tiny folded weight tables -> SMEM, read as scalars in the kernel.
            pl.BlockSpec(memory_space=pltpu.MemorySpace.SMEM),
            pl.BlockSpec(memory_space=pltpu.MemorySpace.SMEM),
            pl.BlockSpec(memory_space=pltpu.MemorySpace.SMEM),
            pl.BlockSpec(memory_space=pltpu.MemorySpace.SMEM),
            # Dense (TILE_R, 128) activation tiles, pipelined over (N, tiles).
            pl.BlockSpec((1, TILE_R, 128), lambda n, t: (n, t, 0)),
            pl.BlockSpec((1, TILE_R, 128), lambda n, t: (n, t, 0)),
        ],
        out_specs=pl.BlockSpec((1, Cout, TILE_R, 128), lambda n, t: (n, 0, t, 0)),
        compiler_params=pltpu.CompilerParams(
            dimension_semantics=("parallel", "parallel"),
            vmem_limit_bytes=32 * 1024 * 1024),
        cost_estimate=pl.CostEstimate(
            flops=flops, transcendentals=0, bytes_accessed=bytes_accessed),
    )(w1_fold, m2, s2, w2b, od, ve)
    return out.reshape(N, Cout, H, W)


def reference(odoc, vessel, params):
    """Pure-JAX reference of the PyTorch forward (NCHW), un-folded."""
    w1a, w1b, w2a, w2b = params

    def conv1x1(w, x):
        return jnp.einsum('oc,nchw->nohw', w, x)

    out_multi = odoc * vessel
    out_add = odoc + vessel
    cat = jnp.concatenate([out_multi, out_add, odoc], axis=1)
    out_se1 = conv1x1(w1b, jax.nn.relu(conv1x1(w1a, cat)))
    out_se1_add = out_se1 + odoc
    out_se2 = conv1x1(w2b, jax.nn.relu(conv1x1(w2a, out_se1_add)))
    return out_se2 + odoc


if __name__ == "__main__":
    # Only shape-consistent configuration of the original forward:
    N, Cf, H, W = 2, 1, 16, 16
    in_channels = 3 * Cf          # 3
    out_channels = in_channels    # 3
    reduction = 1                 # hidden = 3

    key = jax.random.PRNGKey(0)
    k_od, k_ve, k_w = jax.random.split(key, 3)
    odoc = jax.random.normal(k_od, (N, Cf, H, W), jnp.float32)
    vessel = jax.random.normal(k_ve, (N, Cf, H, W), jnp.float32)
    params = init_params(in_channels, out_channels, reduction, k_w)

    out = odoc_inter_vessel(odoc, vessel, params)
    out = jax.block_until_ready(out)

    ref = jax.block_until_ready(reference(odoc, vessel, params))
    assert out.shape == (N, out_channels, H, W), out.shape
    np.testing.assert_allclose(np.asarray(out), np.asarray(ref),
                               rtol=1e-5, atol=1e-5)

    print("KERNEL_OK")
</pallas_src>

<mosaic_0001>
module attributes {stable_mosaic.version = 11 : i64} {
  func.func @_odoc_inter_vessel_kernel(%arg0: i32, %arg1: i32, %arg2: memref<3x3xf32, #tpu.memory_space<smem>>, %arg3: memref<3x3xf32, #tpu.memory_space<smem>>, %arg4: memref<3xf32, #tpu.memory_space<smem>>, %arg5: memref<3x3xf32, #tpu.memory_space<smem>>, %arg6: memref<1x2x128xf32, #tpu.memory_space<vmem>>, %arg7: memref<1x2x128xf32, #tpu.memory_space<vmem>>, %arg8: memref<1x3x2x128xf32, #tpu.memory_space<vmem>>) attributes {dimension_semantics = [#tpu.dimension_semantics<parallel>, #tpu.dimension_semantics<parallel>], iteration_bounds = array<i64: 2, 1>, scalar_prefetch = 0 : i64, scratch_operands = 0 : i64, tpu.core_type = #tpu.core_type<tc>, window_params = [{transform_indices = @transform_0, window_bounds = array<i64: 3, 3>}, {transform_indices = @transform_1, window_bounds = array<i64: 3, 3>}, {transform_indices = @transform_2, window_bounds = array<i64: 3>}, {transform_indices = @transform_3, window_bounds = array<i64: 3, 3>}, {transform_indices = @transform_4, window_bounds = array<i64: 1, 2, 128>}, {transform_indices = @transform_5, window_bounds = array<i64: 1, 2, 128>}, {transform_indices = @transform_6, window_bounds = array<i64: 1, 3, 2, 128>}]} {
    %c0 = arith.constant 0 : index
    %c0_0 = arith.constant 0 : index
    %c0_1 = arith.constant 0 : index
    %0 = vector.load %arg6[%c0, %c0_0, %c0_1] : memref<1x2x128xf32, #tpu.memory_space<vmem>>, vector<1x2x128xf32>
    %1 = vector.shape_cast %0 : vector<1x2x128xf32> to vector<2x128xf32>
    %c0_2 = arith.constant 0 : index
    %c0_3 = arith.constant 0 : index
    %c0_4 = arith.constant 0 : index
    %2 = vector.load %arg7[%c0_2, %c0_3, %c0_4] : memref<1x2x128xf32, #tpu.memory_space<vmem>>, vector<1x2x128xf32>
    %3 = vector.shape_cast %2 : vector<1x2x128xf32> to vector<2x128xf32>
    %4 = arith.mulf %1, %3 : vector<2x128xf32>
    %c0_5 = arith.constant 0 : index
    %c0_6 = arith.constant 0 : index
    %5 = memref.load %arg2[%c0_5, %c0_6] : memref<3x3xf32, #tpu.memory_space<smem>>
    %6 = vector.broadcast %5 : f32 to vector<2x128xf32>
    %7 = arith.mulf %6, %4 : vector<2x128xf32>
    %c0_7 = arith.constant 0 : index
    %c1 = arith.constant 1 : index
    %8 = memref.load %arg2[%c0_7, %c1] : memref<3x3xf32, #tpu.memory_space<smem>>
    %9 = vector.broadcast %8 : f32 to vector<2x128xf32>
    %10 = arith.mulf %9, %1 : vector<2x128xf32>
    %11 = arith.addf %7, %10 : vector<2x128xf32>
    %c0_8 = arith.constant 0 : index
    %c2 = arith.constant 2 : index
    %12 = memref.load %arg2[%c0_8, %c2] : memref<3x3xf32, #tpu.memory_space<smem>>
    %13 = vector.broadcast %12 : f32 to vector<2x128xf32>
    %14 = arith.mulf %13, %3 : vector<2x128xf32>
    %15 = arith.addf %11, %14 : vector<2x128xf32>
    %cst = arith.constant 0.000000e+00 : f32
    %16 = vector.broadcast %cst : f32 to vector<2x128xf32>
    %17 = arith.maximumf %15, %16 : vector<2x128xf32>
    %c1_9 = arith.constant 1 : index
    %c0_10 = arith.constant 0 : index
    %18 = memref.load %arg2[%c1_9, %c0_10] : memref<3x3xf32, #tpu.memory_space<smem>>
    %19 = vector.broadcast %18 : f32 to vector<2x128xf32>
    %20 = arith.mulf %19, %4 : vector<2x128xf32>
    %c1_11 = arith.constant 1 : index
    %c1_12 = arith.constant 1 : index
    %21 = memref.load %arg2[%c1_11, %c1_12] : memref<3x3xf32, #tpu.memory_space<smem>>
    %22 = vector.broadcast %21 : f32 to vector<2x128xf32>
    %23 = arith.mulf %22, %1 : vector<2x128xf32>
    %24 = arith.addf %20, %23 : vector<2x128xf32>
    %c1_13 = arith.constant 1 : index
    %c2_14 = arith.constant 2 : index
    %25 = memref.load %arg2[%c1_13, %c2_14] : memref<3x3xf32, #tpu.memory_space<smem>>
    %26 = vector.broadcast %25 : f32 to vector<2x128xf32>
    %27 = arith.mulf %26, %3 : vector<2x128xf32>
    %28 = arith.addf %24, %27 : vector<2x128xf32>
    %cst_15 = arith.constant 0.000000e+00 : f32
    %29 = vector.broadcast %cst_15 : f32 to vector<2x128xf32>
    %30 = arith.maximumf %28, %29 : vector<2x128xf32>
    %c2_16 = arith.constant 2 : index
    %c0_17 = arith.constant 0 : index
    %31 = memref.load %arg2[%c2_16, %c0_17] : memref<3x3xf32, #tpu.memory_space<smem>>
    %32 = vector.broadcast %31 : f32 to vector<2x128xf32>
    %33 = arith.mulf %32, %4 : vector<2x128xf32>
    %c2_18 = arith.constant 2 : index
    %c1_19 = arith.constant 1 : index
    %34 = memref.load %arg2[%c2_18, %c1_19] : memref<3x3xf32, #tpu.memory_space<smem>>
    %35 = vector.broadcast %34 : f32 to vector<2x128xf32>
    %36 = arith.mulf %35, %1 : vector<2x128xf32>
    %37 = arith.addf %33, %36 : vector<2x128xf32>
    %c2_20 = arith.constant 2 : index
    %c2_21 = arith.constant 2 : index
    %38 = memref.load %arg2[%c2_20, %c2_21] : memref<3x3xf32, #tpu.memory_space<smem>>
    %39 = vector.broadcast %38 : f32 to vector<2x128xf32>
    %40 = arith.mulf %39, %3 : vector<2x128xf32>
    %41 = arith.addf %37, %40 : vector<2x128xf32>
    %cst_22 = arith.constant 0.000000e+00 : f32
    %42 = vector.broadcast %cst_22 : f32 to vector<2x128xf32>
    %43 = arith.maximumf %41, %42 : vector<2x128xf32>
    %c0_23 = arith.constant 0 : index
    %c0_24 = arith.constant 0 : index
    %44 = memref.load %arg3[%c0_23, %c0_24] : memref<3x3xf32, #tpu.memory_space<smem>>
    %45 = vector.broadcast %44 : f32 to vector<2x128xf32>
    %46 = arith.mulf %45, %17 : vector<2x128xf32>
    %c0_25 = arith.constant 0 : index
    %c1_26 = arith.constant 1 : index
    %47 = memref.load %arg3[%c0_25, %c1_26] : memref<3x3xf32, #tpu.memory_space<smem>>
    %48 = vector.broadcast %47 : f32 to vector<2x128xf32>
    %49 = arith.mulf %48, %30 : vector<2x128xf32>
    %50 = arith.addf %46, %49 : vector<2x128xf32>
    %c0_27 = arith.constant 0 : index
    %c2_28 = arith.constant 2 : index
    %51 = memref.load %arg3[%c0_27, %c2_28] : memref<3x3xf32, #tpu.memory_space<smem>>
    %52 = vector.broadcast %51 : f32 to vector<2x128xf32>
    %53 = arith.mulf %52, %43 : vector<2x128xf32>
    %54 = arith.addf %50, %53 : vector<2x128xf32>
    %c0_29 = arith.constant 0 : index
    %55 = memref.load %arg4[%c0_29] : memref<3xf32, #tpu.memory_space<smem>>
    %56 = vector.broadcast %55 : f32 to vector<2x128xf32>
    %57 = arith.mulf %56, %1 : vector<2x128xf32>
    %58 = arith.addf %54, %57 : vector<2x128xf32>
    %cst_30 = arith.constant 0.000000e+00 : f32
    %59 = vector.broadcast %cst_30 : f32 to vector<2x128xf32>
    %60 = arith.maximumf %58, %59 : vector<2x128xf32>
    %c1_31 = arith.constant 1 : index
    %c0_32 = arith.constant 0 : index
    %61 = memref.load %arg3[%c1_31, %c0_32] : memref<3x3xf32, #tpu.memory_space<smem>>
    %62 = vector.broadcast %61 : f32 to vector<2x128xf32>
    %63 = arith.mulf %62, %17 : vector<2x128xf32>
    %c1_33 = arith.constant 1 : index
    %c1_34 = arith.constant 1 : index
    %64 = memref.load %arg3[%c1_33, %c1_34] : memref<3x3xf32, #tpu.memory_space<smem>>
    %65 = vector.broadcast %64 : f32 to vector<2x128xf32>
    %66 = arith.mulf %65, %30 : vector<2x128xf32>
    %67 = arith.addf %63, %66 : vector<2x128xf32>
    %c1_35 = arith.constant 1 : index
    %c2_36 = arith.constant 2 : index
    %68 = memref.load %arg3[%c1_35, %c2_36] : memref<3x3xf32, #tpu.memory_space<smem>>
    %69 = vector.broadcast %68 : f32 to vector<2x128xf32>
    %70 = arith.mulf %69, %43 : vector<2x128xf32>
    %71 = arith.addf %67, %70 : vector<2x128xf32>
    %c1_37 = arith.constant 1 : index
    %72 = memref.load %arg4[%c1_37] : memref<3xf32, #tpu.memory_space<smem>>
    %73 = vector.broadcast %72 : f32 to vector<2x128xf32>
    %74 = arith.mulf %73, %1 : vector<2x128xf32>
    %75 = arith.addf %71, %74 : vector<2x128xf32>
    %cst_38 = arith.constant 0.000000e+00 : f32
    %76 = vector.broadcast %cst_38 : f32 to vector<2x128xf32>
    %77 = arith.maximumf %75, %76 : vector<2x128xf32>
    %c2_39 = arith.constant 2 : index
    %c0_40 = arith.constant 0 : index
    %78 = memref.load %arg3[%c2_39, %c0_40] : memref<3x3xf32, #tpu.memory_space<smem>>
    %79 = vector.broadcast %78 : f32 to vector<2x128xf32>
    %80 = arith.mulf %79, %17 : vector<2x128xf32>
    %c2_41 = arith.constant 2 : index
    %c1_42 = arith.constant 1 : index
    %81 = memref.load %arg3[%c2_41, %c1_42] : memref<3x3xf32, #tpu.memory_space<smem>>
    %82 = vector.broadcast %81 : f32 to vector<2x128xf32>
    %83 = arith.mulf %82, %30 : vector<2x128xf32>
    %84 = arith.addf %80, %83 : vector<2x128xf32>
    %c2_43 = arith.constant 2 : index
    %c2_44 = arith.constant 2 : index
    %85 = memref.load %arg3[%c2_43, %c2_44] : memref<3x3xf32, #tpu.memory_space<smem>>
    %86 = vector.broadcast %85 : f32 to vector<2x128xf32>
    %87 = arith.mulf %86, %43 : vector<2x128xf32>
    %88 = arith.addf %84, %87 : vector<2x128xf32>
    %c2_45 = arith.constant 2 : index
    %89 = memref.load %arg4[%c2_45] : memref<3xf32, #tpu.memory_space<smem>>
    %90 = vector.broadcast %89 : f32 to vector<2x128xf32>
    %91 = arith.mulf %90, %1 : vector<2x128xf32>
    %92 = arith.addf %88, %91 : vector<2x128xf32>
    %cst_46 = arith.constant 0.000000e+00 : f32
    %93 = vector.broadcast %cst_46 : f32 to vector<2x128xf32>
    %94 = arith.maximumf %92, %93 : vector<2x128xf32>
    %c0_47 = arith.constant 0 : index
    %c0_48 = arith.constant 0 : index
    %95 = memref.load %arg5[%c0_47, %c0_48] : memref<3x3xf32, #tpu.memory_space<smem>>
    %96 = vector.broadcast %95 : f32 to vector<2x128xf32>
    %97 = arith.mulf %96, %60 : vector<2x128xf32>
    %c0_49 = arith.constant 0 : index
    %c1_50 = arith.constant 1 : index
    %98 = memref.load %arg5[%c0_49, %c1_50] : memref<3x3xf32, #tpu.memory_space<smem>>
    %99 = vector.broadcast %98 : f32 to vector<2x128xf32>
    %100 = arith.mulf %99, %77 : vector<2x128xf32>
    %101 = arith.addf %97, %100 : vector<2x128xf32>
    %c0_51 = arith.constant 0 : index
    %c2_52 = arith.constant 2 : index
    %102 = memref.load %arg5[%c0_51, %c2_52] : memref<3x3xf32, #tpu.memory_space<smem>>
    %103 = vector.broadcast %102 : f32 to vector<2x128xf32>
    %104 = arith.mulf %103, %94 : vector<2x128xf32>
    %105 = arith.addf %101, %104 : vector<2x128xf32>
    %106 = arith.addf %105, %1 : vector<2x128xf32>
    %c0_53 = arith.constant 0 : index
    %c0_54 = arith.constant 0 : index
    %c0_55 = arith.constant 0 : index
    %c0_56 = arith.constant 0 : index
    %107 = vector.load %arg8[%c0_53, %c0_54, %c0_55, %c0_56] : memref<1x3x2x128xf32, #tpu.memory_space<vmem>>, vector<1x1x2x128xf32>
    %108 = vector.shape_cast %107 : vector<1x1x2x128xf32> to vector<2x128xf32>
    %109 = vector.shape_cast %106 : vector<2x128xf32> to vector<1x1x2x128xf32>
    tpu.vector_store %arg8[%c0_53, %c0_54, %c0_55, %c0_56], %109 {strides = array<i32>} : memref<1x3x2x128xf32, #tpu.memory_space<vmem>>, vector<1x1x2x128xf32>,
    %c1_57 = arith.constant 1 : index
    %c0_58 = arith.constant 0 : index
    %110 = memref.load %arg5[%c1_57, %c0_58] : memref<3x3xf32, #tpu.memory_space<smem>>
    %111 = vector.broadcast %110 : f32 to vector<2x128xf32>
    %112 = arith.mulf %111, %60 : vector<2x128xf32>
    %c1_59 = arith.constant 1 : index
    %c1_60 = arith.constant 1 : index
    %113 = memref.load %arg5[%c1_59, %c1_60] : memref<3x3xf32, #tpu.memory_space<smem>>
    %114 = vector.broadcast %113 : f32 to vector<2x128xf32>
    %115 = arith.mulf %114, %77 : vector<2x128xf32>
    %116 = arith.addf %112, %115 : vector<2x128xf32>
    %c1_61 = arith.constant 1 : index
    %c2_62 = arith.constant 2 : index
    %117 = memref.load %arg5[%c1_61, %c2_62] : memref<3x3xf32, #tpu.memory_space<smem>>
    %118 = vector.broadcast %117 : f32 to vector<2x128xf32>
    %119 = arith.mulf %118, %94 : vector<2x128xf32>
    %120 = arith.addf %116, %119 : vector<2x128xf32>
    %121 = arith.addf %120, %1 : vector<2x128xf32>
    %c0_63 = arith.constant 0 : index
    %c1_64 = arith.constant 1 : index
    %c0_65 = arith.constant 0 : index
    %c0_66 = arith.constant 0 : index
    %122 = vector.load %arg8[%c0_63, %c1_64, %c0_65, %c0_66] : memref<1x3x2x128xf32, #tpu.memory_space<vmem>>, vector<1x1x2x128xf32>
    %123 = vector.shape_cast %122 : vector<1x1x2x128xf32> to vector<2x128xf32>
    %124 = vector.shape_cast %121 : vector<2x128xf32> to vector<1x1x2x128xf32>
    tpu.vector_store %arg8[%c0_63, %c1_64, %c0_65, %c0_66], %124 {strides = array<i32>} : memref<1x3x2x128xf32, #tpu.memory_space<vmem>>, vector<1x1x2x128xf32>,
    %c2_67 = arith.constant 2 : index
    %c0_68 = arith.constant 0 : index
    %125 = memref.load %arg5[%c2_67, %c0_68] : memref<3x3xf32, #tpu.memory_space<smem>>
    %126 = vector.broadcast %125 : f32 to vector<2x128xf32>
    %127 = arith.mulf %126, %60 : vector<2x128xf32>
    %c2_69 = arith.constant 2 : index
    %c1_70 = arith.constant 1 : index
    %128 = memref.load %arg5[%c2_69, %c1_70] : memref<3x3xf32, #tpu.memory_space<smem>>
    %129 = vector.broadcast %128 : f32 to vector<2x128xf32>
    %130 = arith.mulf %129, %77 : vector<2x128xf32>
    %131 = arith.addf %127, %130 : vector<2x128xf32>
    %c2_71 = arith.constant 2 : index
    %c2_72 = arith.constant 2 : index
    %132 = memref.load %arg5[%c2_71, %c2_72] : memref<3x3xf32, #tpu.memory_space<smem>>
    %133 = vector.broadcast %132 : f32 to vector<2x128xf32>
    %134 = arith.mulf %133, %94 : vector<2x128xf32>
    %135 = arith.addf %131, %134 : vector<2x128xf32>
    %136 = arith.addf %135, %1 : vector<2x128xf32>
    %c0_73 = arith.constant 0 : index
    %c2_74 = arith.constant 2 : index
    %c0_75 = arith.constant 0 : index
    %c0_76 = arith.constant 0 : index
    %137 = vector.load %arg8[%c0_73, %c2_74, %c0_75, %c0_76] : memref<1x3x2x128xf32, #tpu.memory_space<vmem>>, vector<1x1x2x128xf32>
    %138 = vector.shape_cast %137 : vector<1x1x2x128xf32> to vector<2x128xf32>
    %139 = vector.shape_cast %136 : vector<2x128xf32> to vector<1x1x2x128xf32>
    tpu.vector_store %arg8[%c0_73, %c2_74, %c0_75, %c0_76], %139 {strides = array<i32>} : memref<1x3x2x128xf32, #tpu.memory_space<vmem>>, vector<1x1x2x128xf32>,
    return
  }
  func.func @transform_0(%arg0: i32, %arg1: i32) -> (i32, i32) {
    %c0_i32 = arith.constant 0 : i32
    %c0_i32_0 = arith.constant 0 : i32
    %c0_i32_1 = arith.constant 0 : i32
    return %c0_i32, %c0_i32_0 : i32, i32
  }
  func.func @transform_1(%arg0: i32, %arg1: i32) -> (i32, i32) {
    %c0_i32 = arith.constant 0 : i32
    %c0_i32_0 = arith.constant 0 : i32
    %c0_i32_1 = arith.constant 0 : i32
    return %c0_i32, %c0_i32_0 : i32, i32
  }
  func.func @transform_2(%arg0: i32, %arg1: i32) -> i32 {
    %c0_i32 = arith.constant 0 : i32
    %c0_i32_0 = arith.constant 0 : i32
    return %c0_i32 : i32
  }
  func.func @transform_3(%arg0: i32, %arg1: i32) -> (i32, i32) {
    %c0_i32 = arith.constant 0 : i32
    %c0_i32_0 = arith.constant 0 : i32
    %c0_i32_1 = arith.constant 0 : i32
    return %c0_i32, %c0_i32_0 : i32, i32
  }
  func.func @transform_4(%arg0: i32, %arg1: i32) -> (i32, i32, i32) {
    %c0_i32 = arith.constant 0 : i32
    %c0_i32_0 = arith.constant 0 : i32
    return %arg0, %arg1, %c0_i32 : i32, i32, i32
  }
  func.func @transform_5(%arg0: i32, %arg1: i32) -> (i32, i32, i32) {
    %c0_i32 = arith.constant 0 : i32
    %c0_i32_0 = arith.constant 0 : i32
    return %arg0, %arg1, %c0_i32 : i32, i32, i32
  }
  func.func @transform_6(%arg0: i32, %arg1: i32) -> (i32, i32, i32, i32) {
    %c0_i32 = arith.constant 0 : i32
    %c0_i32_0 = arith.constant 0 : i32
    %c0_i32_1 = arith.constant 0 : i32
    return %arg0, %c0_i32, %arg1, %c0_i32_0 : i32, i32, i32, i32
  }
}

</mosaic_0001>

<bundles_post_ra>
// kernel: tpu_custom_call.1
= control target key start
LH: loop header
LB: loop body
LE: loop exit
PB: predicated region body
PF: predicated region fallthrough
CT: control target
= control target key end

     0   :  { %s1262_s0 = inlined_call_operand.hbm [shape: f32[3,3], index: 0, kind: input, shape index: {}]   ;;  %s1263_s1 = inlined_call_operand.hbm [shape: f32[3,3], index: 1, kind: input, shape index: {}]   ;;  %s1264_s2 = inlined_call_operand.vmem [shape: f32[3], index: 2, kind: input, shape index: {}]   ;;  %s1265_s3 = inlined_call_operand.vmem [shape: f32[3,3], index: 3, kind: input, shape index: {}]   ;;  %s1266_s4 = inlined_call_operand.hbm [shape: f32[2,2,128], index: 4, kind: input, shape index: {}]   ;;  %s1267_s5 = inlined_call_operand.vmem [shape: f32[2,2,128], index: 5, kind: input, shape index: {}]   ;;  %s1268_s6 = inlined_call_operand.hbm [shape: f32[2,3,2,128], index: 6, kind: output, shape index: {}]  }
   0x1   :  { %1272 = sst [smem:[#allocation20_spill]] %s1262_s0 }
   0x2   :  { %1273 = sst [smem:[#allocation21_spill]] %s1263_s1 }
   0x3   :  { %1274 = sst [smem:[#allocation22_spill]] %s1264_s2 }
   0x4   :  { %11 = vsyncpa [#allocation5], 0 }
   0x5   :  { %12 = vsyncpa [#allocation8], 0 }
   0x6   :  { %13 = vsyncpa [#allocation6], 0 }
   0x7   :  { %14 = vsyncpa [#allocation11], 0 }
   0x8   :  { %15 = vsyncpa [#allocation3], 0 }
   0x9   :  { %17 = vsyncpa [#allocation3 + $0x1], 0 }
   0xa   :  { %18 = vsyncpa [#allocation4], 0 }
   0xb   :  { %20 = vsyncpa [#allocation4 + $0x1], 0  ;;  %s1023_s21 = smov 0   ;;  %s1025_s22 = smov 0  }
   0xc   :  { %s1027_s23 = smov 0   ;;  %s1029_s24 = smov 0  }
   0xd   :  { %s1031_s25 = smov 0   ;;  %s1033_s26 = smov 0  }
   0xe LB: > { %s647_s27 = sadd.s32 4294967295, %s978_s26   ;;  %p649_p0 = scmp.ge.s32.totalorder %s978_s26, 1  ;;  %s978_s26 = sphi %s1033_s26, %s26_s26   ;;  %s974_s25 = sphi %s1031_s25, %s1294_s25   ;;  %s970_s24 = sphi %s1029_s24, %s1293_s24   ;;  %s966_s23 = sphi %s1027_s23, %s1292_s23   ;;  %s962_s22 = sphi %s1025_s22, %s1291_s22   ;;  %s958_s21 = sphi %s1023_s21, %s1290_s21  }
   0xf   : > { %p1057_p1 = scmp.eq.s32.totalorder %s647_s27, 0  ;;  %p211_p2 = scmp.lt.s32.totalorder %s978_s26, 3 }
  0x10   : > { %s1277_s2 = sld [smem:[#allocation22_spill]]  ;;  %s253_s11 = sshll.u32 %s1265_s3, 4  ;;  %s254_s11 = int_to_ptr.vmem [resolvable:$true] %s253_s11 }
  0x11   : > { %s1275_s28 = scalar_select %p1057_p1, 1, 0 }
  0x12   : > { %p1062_p3 = pnand %p649_p0, %p211_p2  ;;  %s980_s13 = smov [#allocation2]  }
  0x13   : > { %s1279_s0 = sld [smem:[#allocation20_spill]]  ;;  %s981_s16 = smov [#allocation7]  }
  0x14   : > { %s1276_s29 = scalar_select %p1062_p3, 1, 0 }
  0x15   : > { %p717_p5 = pneg %p1062_p3  ;;  %s1280_s1 = sld [smem:[#allocation21_spill]] }
  0x16   : > { %s242_s8 = sshll.u32 %s1277_s2, 4  ;;  %s243_s8 = int_to_ptr.vmem [resolvable:$true] %s242_s8 }
  0x17   : > { %p1077_p6 = pnand %p717_p5, %p1057_p1  ;;  %s824_s19 = scalar_lea.vmem %s243_s8, 16 }
  0x18   : > { %p825_p7 = scmp.ne.s32.totalorder %s243_s8, %s824_s19  ;;  %p832_p11 = scmp.lt.s32.totalorder %s243_s8, %s243_s8 }
  0x19   : > { %720 = dma.hbm_to_smem (!%p1077_p6), %s1279_s0, 64, %s980_s13, [#allocation5]  }
  0x1a   : > { %p826_p8 = pneg %p1077_p6  ;;  %p833_p12 = scmp.lt.s32.totalorder %s824_s19, %s824_s19 }
  0x1b   : > { %723 = dma.hbm_to_smem (!%p1077_p6), %s1280_s1, 64, %s981_s16, [#allocation8]  }
  0x1c   : > { %p827_p9 = pnand %p826_p8, %p825_p7  ;;  %p834_p13 = por %p833_p12, %p832_p11 }
  0x1e   : > { %p828_p10 = pneg %p827_p9 }
  0x20   : > { %p835_p0 = pnand %p834_p13, %p828_p10 }
  0x22   : > { %838 = shalt.err (!%p835_p0)
}
  0x23   : > { %s982_s20 = smov [#allocation9]   ;;  %s839_s30 = scalar_lea.vmem %s254_s11, 64 }
  0x24   : > { %726 = dma.vmem_to_smem (!%p1077_p6), %s243_s8, 16, %s982_s20, [#allocation6]  }
  0x25   : > { %p840_p2 = scmp.ne.s32.totalorder %s254_s11, %s839_s30  ;;  %p847_p3 = scmp.lt.s32.totalorder %s254_s11, %s254_s11 }
  0x26   : > { %p848_p1 = scmp.lt.s32.totalorder %s839_s30, %s839_s30 }
  0x27   : > { %p842_p5 = pnand %p840_p2, %p826_p8 }
  0x28   : > { %p849_p7 = por %p848_p1, %p847_p3 }
  0x29   : > { %p843_p4 = pneg %p842_p5 }
  0x2b   : > { %p850_p9 = pnand %p849_p7, %p843_p4 }
  0x2d   : > { %853 = shalt.err (!%p850_p9)
}
  0x2e   : > { %s983_s7 = smov [#allocation10]   ;;  %s648_s8 = sadd.s32 4294967294, %s978_s26  }
  0x2f   : > { %729 = dma.vmem_to_smem (!%p1077_p6), %s254_s11, 64, %s983_s7, [#allocation11]  }
  0x30   : > { %s38_s9 = sadd.s32 1, %s974_s25  ;;  %s131_s10 = sadd.s32 1, %s966_s23 }
  0x31   : > { %p40_p1 = scmp.ge.s32.totalorder %s38_s9, 2  ;;  %p138_p3 = scmp.ne.s32.totalorder %s966_s23, %s962_s22 }
  0x32   : > { %p139_p4 = scmp.eq.s32.totalorder %s978_s26, 0  ;;  %p144_p10 = scmp.ne.s32.totalorder %s962_s22, %s958_s21 }
  0x33   : > { %s1296_s9 = smov (%p40_p1, %s38_s9), 0  ;;  %p198_p6 = scmp.eq.s32.totalorder %s647_s27, 1 }
  0x34   : > { %p1105_p8 = por %p139_p4, %p138_p3  ;;  %s126_s11 = ssub.s32 %s974_s25, %s1296_s9 }
  0x35   : > { %p129_p11 = scmp.eq.s32.totalorder %s126_s11, 0  ;;  %p1282_p12 = scmp.ne.s32.totalorder %s1275_s28, 0 }
  0x36   : > { %p1121_p0 = por %p198_p6, %p138_p3  ;;  %p204_p2 = scmp.eq.s32.totalorder %s648_s8, 1 }
  0x37   : > { %p1117_p13 = por %p1282_p12, %p144_p10  ;;  %p742_p7 = scmp.lt.s32.totalorder %s978_s26, 2 }
  0x38   : > { %s1126_s15 = scalar_select %p129_p11, %s966_s23, %s131_s10  }
  0x39   : > { %p1128_p5 = por %p204_p2, %p144_p10  ;;  %s264_s17 = sand.u32 1, %s966_s23  }
  0x3a   : > { %s656_s27 = sshll.u32 %s974_s25, 5  ;;  %s655_s18 = sshll.u32 %s264_s17, 1 }
  0x3b   : > { %s274_s30 = scalar_lea.hbm %s1266_s4, %s656_s27  ;;  %s268_s7 = scalar_lea.vmem [#allocation12], %s655_s18 }
  0x3c   : > { %s276_s11 = sshll.u32 %s268_s7, 4  ;;  %p1140_p9 = pnand %p742_p7, %p1105_p8  ;;  %s277_s11 = int_to_ptr.vmem [resolvable:$true] %s276_s11 }
  0x3d   : > { %s265_s8 = scalar_lea.sflag [#allocation3], %s264_s17  ;;  %s867_s10 = scalar_lea.vmem %s277_s11, 32 }
  0x3e   : > { %p856_p1 = pneg %p1140_p9  ;;  %p868_p3 = scmp.ne.s32.totalorder %s277_s11, %s867_s10 }
  0x3f   : > { %s984_s1 = smov [#allocation12]  }
  0x40   : > { %p870_p4 = pnand %p868_p3, %p856_p1  ;;  %s872_s2 = sshll.u32 %s984_s1, 4  ;;  %s873_s2 = int_to_ptr.vmem [resolvable:$false] %s872_s2 }
  0x41   : > { %s874_s27 = scalar_lea.vmem %s873_s2, 64  ;;  %p875_p6 = scmp.lt.s32.totalorder %s277_s11, %s873_s2 }
  0x42   : > { %p871_p10 = pneg %p870_p4  ;;  %p876_p11 = scmp.lt.s32.totalorder %s874_s27, %s867_s10 }
  0x44   : > { %p877_p12 = por %p876_p11, %p875_p6 }
  0x46   : > { %p878_p8 = pnand %p877_p12, %p871_p10 }
  0x48   : > { %881 = shalt.err (!%p878_p8)
}
  0x49   : > { %733 = dma.hbm_to_vmem [thread:$0]  (!%p1140_p9), %s274_s30, 32, %s277_s11, %s265_s8  }
  0x4a   : > { %p1287_p2 = scmp.ne.s32.totalorder %s1276_s29, 0 }
  0x4b   : > { %p1288_p7 = scmp.ne.s32.totalorder (!%p1287_p2), %s1275_s28, 0 }
  0x4c   : > { %295 = sbr.rel (%p1287_p2) target bundleno = 152 (0x98), region = 44 }
  0x51   : > { %933 = dma.done.wait (%p1288_p7), [#allocation5], 64  }
  0x52   : > { %935 = vsyncadd (%p1288_p7), [#allocation5], 4294967232 }
  0x53   : > { %937 = dma.done.wait (%p1288_p7), [#allocation8], 64  }
  0x54   : > { %939 = vsyncadd (%p1288_p7), [#allocation8], 4294967232 }
  0x55   : > { %941 = dma.done.wait (%p1288_p7), [#allocation6], 16  }
  0x56   : > { %943 = vsyncadd (%p1288_p7), [#allocation6], 4294967280 }
  0x57   : > { %945 = dma.done.wait (%p1288_p7), [#allocation11], 64  }
  0x58   : > { %947 = vsyncadd (%p1288_p7), [#allocation11], 4294967232  ;;  %s1167_s0 = sand.u32 1, %s962_s22  }
  0x59   : > { %s662_s1 = sshll.u32 %s1167_s0, 1  ;;  %s314_s2 = scalar_lea.sflag [#allocation3], %s1167_s0 }
  0x5a   : > { %s317_s29 = scalar_lea.vmem [#allocation12], %s662_s1 }
  0x5b   : > { %949 = dma.done.wait (%p1117_p13), %s314_s2, 32  }
  0x5c   : > { %951 = vsyncadd (%p1117_p13), %s314_s2, 4294967264 }
  0x5d   : > { %322 = sfence }
  0x5e   : > { %p354_p9 = scmp.lt.s32.totalorder %s970_s24, 1  ;;  %s364_s28 = sld [smem:[#allocation2]]  ;;  %v1177_v0 = vld [vmem:[%s317_s29] sm:$0x3] }
  0x5f   : > { %s664_s12 = sld [smem:[#allocation2 + $0x1]] }
  0x60   : > { %s355_s17 = scalar_select %p354_p9, %s970_s24, 1 }
  0x61   : > { %s665_s18 = sld [smem:[#allocation2 + $0x2]] }
  0x62   : > { %s663_s19 = sshll.u32 %s355_s17, 1  ;;  %s666_s20 = sld [smem:[#allocation2 + $0x80]] }
  0x63   : > { %s360_s11 = scalar_lea.vmem %s1267_s5, %s663_s19  ;;  %s667_s8 = sld [smem:[#allocation2 + $0x81]] }
  0x64   : > { %v362_v1 = vld [vmem:[%s360_s11] sm:$0x3]  ;;  %v365_v2 = vstv %s364_s28  ;;  %s668_s13 = sld [smem:[#allocation2 + $0x82]] }
  0x65   : > { %v363_v3 = vmul.f32 %v362_v1, %v1177_v0  ;;  %v368_v4 = vstv %s664_s12  ;;  %s669_s10 = sld [smem:[#allocation2 + $0x100]] }
  0x66   : > { %v369_v5 = vmul.f32 %v368_v4, %v1177_v0  ;;  %s670_s27 = sld [smem:[#allocation2 + $0x101]] }
  0x67   : > { %v366_v6 = vmul.f32 %v365_v2, %v363_v3  ;;  %v372_v7 = vstv %s665_s18  ;;  %s671_s1 = sld [smem:[#allocation2 + $0x102]] }
  0x68   : > { %v373_v8 = vmul.f32 %v372_v7, %v362_v1  ;;  %v377_v9 = vstv %s666_s20  ;;  %s400_s2 = sld [smem:[#allocation7]] }
  0x69   : > { %v370_v10 = vadd.f32 %v369_v5, %v366_v6  ;;  %v378_v11 = vmul.f32 %v377_v9, %v363_v3  ;;  %v380_v12 = vstv %s667_s8  ;;  %s672_s29 = sld [smem:[#allocation7 + $0x1]] }
  0x6a   : > { %v381_v13 = vmul.f32 %v380_v12, %v1177_v0  ;;  %v384_v14 = vstv %s668_s13  ;;  %s1185_s28 = sld [smem:[#allocation7 + $0x2]] }
  0x6b   : > { %v374_v15 = vadd.f32 %v373_v8, %v370_v10  ;;  %v385_v16 = vmul.f32 %v384_v14, %v362_v1  ;;  %v389_v17 = vstv %s669_s10  ;;  %s1187_s12 = sld [smem:[#allocation9]] }
  0x6c   : > { %v382_v18 = vadd.f32 %v381_v13, %v378_v11  ;;  %v390_v19 = vmul.f32 %v389_v17, %v363_v3  ;;  %v392_v20 = vstv %s670_s27  ;;  %s674_s17 = sld [smem:[#allocation7 + $0x80]] }
  0x6d   : > { %v375_v21 = vmax.f32 %v374_v15, 0.0  ;;  %v393_v22 = vmul.f32 %v392_v20, %v1177_v0  ;;  %v396_v23 = vstv %s671_s1  ;;  %s675_s18 = sld [smem:[#allocation7 + $0x81]] }
  0x6e   : > { %v386_v24 = vadd.f32 %v385_v16, %v382_v18  ;;  %v397_v25 = vmul.f32 %v396_v23, %v362_v1  ;;  %v401_v26 = vstv %s400_s2  ;;  %s676_s19 = sld [smem:[#allocation7 + $0x82]] }
  0x6f   : > { %v394_v27 = vadd.f32 %v393_v22, %v390_v19  ;;  %v404_v28 = vstv %s672_s29  ;;  %s677_s20 = sld [smem:[#allocation9 + $0x1]]  ;;  %v402_v30 = vmul.f32 %v401_v26, %v375_v21 }
  0x70   : > { %v387_v29 = vmax.f32 %v386_v24, 0.0  ;;  %s678_s30 = sld [smem:[#allocation7 + $0x100]]  ;;  %v408_v33 = vstv %s1185_s28 }
  0x71   : > { %v398_v31 = vadd.f32 %v397_v25, %v394_v27  ;;  %s679_s7 = sld [smem:[#allocation7 + $0x101]]  ;;  %v412_v34 = vstv %s1187_s12 }
  0x72   : > { %v405_v32 = vmul.f32 %v404_v28, %v387_v29  ;;  %v417_v35 = vstv %s674_s17  ;;  %s680_s11 = sld [smem:[#allocation7 + $0x102]]  ;;  %v413_v43 = vmul.f32 %v412_v34, %v1177_v0 }
  0x73   : > { %v399_v36 = vmax.f32 %v398_v31, 0.0  ;;  %v418_v37 = vmul.f32 %v417_v35, %v375_v21  ;;  %v420_v38 = vstv %s675_s18  ;;  %s681_s8 = sld [smem:[#allocation9 + $0x2]]  ;;  %s695_s18 = smul.u32 6, %s1167_s0 }
  0x74   : > { %v406_v39 = vadd.f32 %v405_v32, %v402_v30  ;;  %v421_v40 = vmul.f32 %v420_v38, %v387_v29  ;;  %v424_v41 = vstv %s676_s19  ;;  %s1192_s13 = sld [smem:[#allocation10]] }
  0x75   : > { %v409_v42 = vmul.f32 %v408_v33, %v399_v36  ;;  %v425_v44 = vmul.f32 %v424_v41, %v399_v36  ;;  %v428_v45 = vstv %s677_s20  ;;  %s1195_s10 = sld [smem:[#allocation10 + $0x1]]  ;;  %s353_s19 = scalar_lea.vmem [#allocation13], %s695_s18 }
  0x76   : > { %v422_v46 = vadd.f32 %v421_v40, %v418_v37  ;;  %v429_v47 = vmul.f32 %v428_v45, %v1177_v0  ;;  %v433_v48 = vstv %s678_s30  ;;  %s1198_s27 = sld [smem:[#allocation10 + $0x2]]  ;;  %s504_s20 = sshll.u32 %s353_s19, 4  ;;  %s1208_s20 = int_to_ptr.vmem [resolvable:$true] %s504_s20 }
  0x77   : > { %v410_v49 = vadd.f32 %v409_v42, %v406_v39  ;;  %v434_v50 = vmul.f32 %v433_v48, %v375_v21  ;;  %v436_v51 = vstv %s679_s7  ;;  %s684_s1 = sld [smem:[#allocation10 + $0x80]]  ;;  %s696_s30 = smul.u32 96, %s970_s24 }
  0x78   : > { %v426_v52 = vadd.f32 %v425_v44, %v422_v46  ;;  %v437_v53 = vmul.f32 %v436_v51, %v387_v29  ;;  %v440_v54 = vstv %s680_s11  ;;  %s685_s2 = sld [smem:[#allocation10 + $0x81]]  ;;  %s490_s24 = scalar_lea.sflag [#allocation4], %s1167_s0 }
  0x79   : > { %v414_v55 = vadd.f32 %v413_v43, %v410_v49  ;;  %v441_v56 = vmul.f32 %v440_v54, %v399_v36  ;;  %v444_v57 = vstv %s681_s8  ;;  %s686_s29 = sld [smem:[#allocation10 + $0x82]]  ;;  %s1214_s8 = scalar_lea.hbm %s1268_s6, %s696_s30 }
  0x7a   : > { %v430_v58 = vadd.f32 %v429_v47, %v426_v52  ;;  %v438_v59 = vadd.f32 %v437_v53, %v434_v50  ;;  %v445_v60 = vmul.f32 %v444_v57, %v1177_v0  ;;  %v449_v61 = vstv %s1192_s13  ;;  %s688_s28 = sld [smem:[#allocation10 + $0x100]]  ;;  %s882_s13 = scalar_lea.vmem %s1208_s20, 96 }
  0x7b   : > { %v415_v62 = vmax.f32 %v414_v55, 0.0  ;;  %v452_v63 = vstv %s1195_s10  ;;  %s689_s12 = sld [smem:[#allocation10 + $0x101]]  ;;  %p883_p13 = scmp.ne.s32.totalorder %s1208_s20, %s882_s13 }
  0x7c   : > { %v431_v1 = vmax.f32 %v430_v58, 0.0  ;;  %v442_v2 = vadd.f32 %v441_v56, %v438_v59  ;;  %s690_s17 = sld [smem:[#allocation10 + $0x102]]  ;;  %v456_v9 = vstv %s1198_s27  ;;  %s985_s10 = smov [#allocation13]  }
  0x7d   : > { %v450_v3 = vmul.f32 %v449_v61, %v415_v62  ;;  %v462_v4 = vstv %s684_s1  ;;  %p884_p1 = pnand %p883_p13, %p1121_p0  ;;  %s886_s27 = sshll.u32 %s985_s10, 4  ;;  %s887_s27 = int_to_ptr.vmem [resolvable:$false] %s886_s27 }
  0x7e   : > { %v446_v5 = vadd.f32 %v445_v60, %v442_v2  ;;  %v453_v6 = vmul.f32 %v452_v63, %v431_v1  ;;  %v463_v7 = vmul.f32 %v462_v4, %v415_v62  ;;  %v465_v8 = vstv %s685_s2  ;;  %s888_s1 = scalar_lea.vmem %s887_s27, 192  ;;  %p889_p4 = scmp.lt.s32.totalorder %s1208_s20, %s887_s27 }
  0x7f   : > { %v466_v10 = vmul.f32 %v465_v8, %v431_v1  ;;  %v469_v11 = vstv %s686_s29  ;;  %p885_p3 = pneg %p884_p1  ;;  %p890_p10 = scmp.lt.s32.totalorder %s888_s1, %s882_s13 }
  0x80   : > { %v447_v12 = vmax.f32 %v446_v5, 0.0  ;;  %v454_v13 = vadd.f32 %v453_v6, %v450_v3  ;;  %v476_v14 = vstv %s688_s28 }
  0x81   : > { %v467_v15 = vadd.f32 %v466_v10, %v463_v7  ;;  %v477_v16 = vmul.f32 %v476_v14, %v415_v62  ;;  %v479_v17 = vstv %s689_s12  ;;  %p891_p6 = por %p890_p10, %p889_p4 }
  0x82   : > { %v457_v18 = vmul.f32 %v456_v9, %v447_v12  ;;  %v470_v19 = vmul.f32 %v469_v11, %v447_v12  ;;  %v480_v20 = vmul.f32 %v479_v17, %v431_v1  ;;  %v483_v21 = vstv %s690_s17 }
  0x83   : > { %v484_v22 = vmul.f32 %v483_v21, %v447_v12  ;;  %p892_p11 = pnand %p891_p6, %p885_p3 }
  0x84   : > { %v458_v23 = vadd.f32 %v457_v18, %v454_v13  ;;  %v471_v24 = vadd.f32 %v470_v19, %v467_v15  ;;  %v481_v25 = vadd.f32 %v480_v20, %v477_v16 }
  0x86   : > { %v459_v26 = vadd.f32 %v458_v23, %v1177_v0  ;;  %v472_v27 = vadd.f32 %v471_v24, %v1177_v0  ;;  %v485_v28 = vadd.f32 %v484_v22, %v481_v25 }
  0x88   : > { %460 = vst [vmem:[%s353_s19] sm:$0x3] %v459_v26  ;;  %687 = vst [vmem:[%s353_s19 + $0x2] sm:$0x3] %v472_v27  ;;  %v486_v29 = vadd.f32 %v485_v28, %v1177_v0 }
  0x8a   : > { %691 = vst [vmem:[%s353_s19 + $0x4] sm:$0x3] %v486_v29 }
  0x8b   : > { %895 = shalt.err (!%p892_p11)
}
  0x8c   : > { %s896_s2 = scalar_lea.hbm %s1214_s8, 96  ;;  %s900_s12 = scalar_lea.hbm %s1268_s6, 192 }
  0x8d   : > { %p897_p12 = scmp.ne.s32.totalorder %s1214_s8, %s896_s2  ;;  %p901_p7 = scmp.lt.s32.totalorder %s1214_s8, %s1268_s6 }
  0x8e   : > { %p902_p9 = scmp.lt.s32.totalorder %s900_s12, %s896_s2 }
  0x8f   : > { %p898_p8 = pnand %p897_p12, %p1121_p0 }
  0x90   : > { %p903_p13 = por %p902_p9, %p901_p7 }
  0x91   : > { %p899_p2 = pneg %p898_p8 }
  0x93   : > { %p904_p1 = pnand %p903_p13, %p899_p2 }
  0x95   : > { %907 = shalt.err (!%p904_p1)
}
  0x96   : > { %s986_s19 = smov 32   ;;  %s987_s30 = smov 2  }
  0x97   : > { %715 = dma.vmem_to_hbm [thread:$0]  (%p1121_p0), %s1208_s20, 96, %s1214_s8, %s490_s24, %s986_s19, %s986_s19, %s987_s30  }
  0x98 PF: > { %s519_s7 = sand.u32 1, %s958_s21   ;;  %p1289_p3 = scmp.ge.s32.totalorder %s978_s26, 2 }
  0x99   : > { %s520_s11 = scalar_lea.sflag [#allocation4], %s519_s7 }
  0x9a   : > { %p735_p4 = pnand %p1289_p3, %p1128_p5 }
  0x9c   : > { %p736_p10 = pneg %p735_p4 }
  0x9e   : > { %953 = dma.done.wait (%p736_p10), %s520_s11, 96  }
  0x9f   : > { %955 = vsyncadd (%p736_p10), %s520_s11, 4294967200  ;;  %s26_s26 = sadd.s32 1, %s978_s26   ;;  %s1290_s21 = smov %s962_s22 }
  0xa0   : > { %p23_p6 = scmp.ge.s32.totalorder %s26_s26, 4   ;;  %s1291_s22 = smov %s966_s23 }
  0xa1   : > { %s1292_s23 = smov %s1126_s15  ;;  %s1293_s24 = smov %s974_s25 }
  0xa2   : > { %s1294_s25 = smov %s1296_s9  ;;  %25 = sbr.rel (!%p23_p6) target bundleno = 14 (0xe), region = 112 }
  0xa7   :  { %525 = vsyncpa [#allocation3], 1 }
  0xa8   :  { %527 = vsyncpa [#allocation3 + $0x1], 1 }
  0xa9   :  { %528 = vsyncpa [#allocation4], 1 }
  0xaa   :  { %530 = vsyncpa [#allocation4 + $0x1], 1 }
  0xab   :  { %531 = vsyncpa [#allocation5], 1 }
  0xac   :  { %533 = vsyncpa [#allocation5 + $0x1], 1 }
  0xad   :  { %534 = vsyncpa [#allocation8], 1 }
  0xae   :  { %535 = vsyncpa [#allocation6], 1 }
  0xaf   :  { %537 = vsyncpa [#allocation6 + $0x1], 1 }
  0xb0   :  { %538 = vsyncpa [#allocation11], 1 }

</bundles_post_ra>
